<compile_context>
chip_gen: v7x
topology: tpu7x:2x2x1
jax: 0.10.0
libtpu: 0.0.40
codegen_flags: <defaults>
</compile_context>

<pallas_src>
import numpy as np
import jax
import jax.numpy as jnp
from jax.experimental import pallas as pl
from jax.experimental.pallas import tpu as pltpu


def _las_kernel(x_ref, side_ref, out_ref):
    """One batch tile: per-row label-aware-smoothed loss, summed to a partial.

    side_ref columns (f32): [target-as-float, valid*(1-smoothing), valid*smoothing].
    Padded rows carry (0, 0, 0) and therefore contribute exactly zero.
    """
    x = x_ref[...].astype(jnp.float32)        # (TB, C) logits, f32 in-register
    side = side_ref[...]                      # (TB, 3)
    tgt = side[:, 0:1].astype(jnp.int32)      # exact: class ids < 2**24
    w_nll = side[:, 1:2]                      # valid * (1 - smoothing)
    w_sm = side[:, 2:3]                       # valid * smoothing

    TB, C = x.shape
    use_mxu = (C % 128 == 0)                  # static (trace-time) gate

    # Numerically stable log-sum-exp per row.
    m = jnp.max(x, axis=-1, keepdims=True)                              # XLU
    e = jnp.exp(x - m)                                                  # EUP

    if use_mxu:
        # Push the plain row-sums onto the otherwise-idle MXU (frees XLU/VALU
        # slots).  N=128 keeps the matmul in a fully native layout.
        ones = jnp.full((C, 128), 1.0, dtype=jnp.float32)
        sum_e = jnp.dot(e, ones, preferred_element_type=jnp.float32)[:, 0:1]
        x_sum = jnp.dot(x, ones, preferred_element_type=jnp.float32)[:, 0:1]
    else:
        sum_e = jnp.sum(e, axis=-1, keepdims=True)
        x_sum = jnp.sum(x, axis=-1, keepdims=True)

    lse = jnp.log(sum_e) + m                                            # (TB, 1)
    x_mean = x_sum * (1.0 / C)                                          # (TB, 1)

    # Gathered logit x[row, target[row]]: data-dependent gather has no
    # rectangular BlockSpec form -> compare + select + lane reduce.
    class_ids = jax.lax.broadcasted_iota(jnp.int32, (TB, C), dimension=1)
    x_tgt = jnp.sum(jnp.where(class_ids == tgt, x, 0.0), axis=-1, keepdims=True)

    # Algebraic forms -- no (TB, C) logprobs intermediate:
    #   nll_loss    = -logprobs[target] = lse - x[target]
    #   smooth_loss = -mean(logprobs)   = lse - mean(x)
    loss = w_nll * (lse - x_tgt) + w_sm * (lse - x_mean)                # (TB, 1)

    # Independent, lane-dense per-tile partial (unmasked full-tile store).
    out_ref[...] = jnp.broadcast_to(jnp.sum(loss), out_ref.shape)


def _pick_block_b(B, C, itemsize):
    """VMEM- & C-aware batch-tile size.

    * targets ~2 MiB of logits per grid step (tile sweeps show 0.5-2 MiB steps
      reach ~85% of HBM roofline; smaller leaves 15-40% on the table),
    * caps the per-step working set (2x double-buffered x tile + ~3 (TB,C) f32
      temporaries) at ~24 MiB so it fits v7x's 32 MiB scoped VMEM and the
      limit requested on v5e/v6e,
    * keeps >= ~4 grid steps when the batch allows (v7x dual-TC balance,
      pipeline depth),
    * respects the (8,128)/(16,128) min sublane tiling for f32/bf16.
    """
    sub = 16 if itemsize < 4 else 8
    b_pad_min = ((B + sub - 1) // sub) * sub
    per_row_tile = C * itemsize                 # bytes of one logits row (HBM dtype)
    per_row_work = C * (2 * itemsize + 12)      # 2x db input + ~3 f32 temporaries
    tb = (2 << 20) // max(per_row_tile, 1)
    tb = min(tb, (24 << 20) // max(per_row_work, 1))
    tb = min(tb, 4096)
    tb = min(tb, -(-b_pad_min // 4))            # aim for >= 4 grid steps
    tb = max(sub, (tb // sub) * sub)
    tb = min(tb, b_pad_min)
    return tb


def label_aware_smoothing_loss(x, target, smooth, *, block_b=None):
    """x: [B, C] float (f32 or bf16), target: [B] int, smooth: [C] float -> scalar f32."""
    B, C = x.shape
    assert C < (1 << 24), "class ids must round-trip exactly through float32"
    itemsize = jnp.dtype(x.dtype).itemsize
    if block_b is None:
        block_b = _pick_block_b(B, C, itemsize)

    B_pad = ((B + block_b - 1) // block_b) * block_b
    grid_b = B_pad // block_b

    # O(B) wrapper-side prep: per-row smoothing gather + loss weights, packed
    # into ONE narrow side input (halves the tiny per-step DMAs).  Padded rows
    # get all-zero weights so they contribute exactly nothing.
    smoothing = smooth.astype(jnp.float32)[target]
    side = jnp.stack(
        [target.astype(jnp.float32), 1.0 - smoothing, smoothing], axis=1)
    if B_pad != B:
        x = jnp.pad(x, ((0, B_pad - B), (0, 0)))
        side = jnp.pad(side, ((0, B_pad - B), (0, 0)))

    # TODO(synk): very large class counts (C in the tens of thousands) need a
    # second 'arbitrary' grid axis over C with an online-LSE accumulator to
    # keep the per-step working set inside VMEM; not implemented here.
    est_vmem = block_b * C * (2 * itemsize + 12) + (1 << 20)
    vmem_limit = int(min(64 << 20, max(32 << 20, est_vmem)))

    cost = pl.CostEstimate(
        flops=6 * B_pad * C,
        transcendentals=B_pad * C,                       # exp
        bytes_accessed=B_pad * C * itemsize + B_pad * 3 * 4 + grid_b * 128 * 4,
    )

    partials = pl.pallas_call(
        _las_kernel,
        out_shape=jax.ShapeDtypeStruct((grid_b, 1, 128), jnp.float32),
        grid_spec=pltpu.PrefetchScalarGridSpec(
            num_scalar_prefetch=0,
            grid=(grid_b,),
            in_specs=[
                pl.BlockSpec((block_b, C), lambda i: (i, 0)),
                pl.BlockSpec((block_b, 3), lambda i: (i, 0)),
            ],
            out_specs=pl.BlockSpec((1, 1, 128), lambda i: (i, 0, 0)),
        ),
        compiler_params=pltpu.CompilerParams(
            dimension_semantics=("parallel",),
            vmem_limit_bytes=vmem_limit,
        ),
        cost_estimate=cost,
    )(x, side)

    # Tiny final reduction over per-tile partials, then mean over the REAL batch.
    return jnp.sum(partials[:, 0, 0]) / B


def make_smooth(cls_num_list, smooth_head, smooth_tail, shape='concave', power=None):
    """Deterministic reimplementation of LabelAwareSmoothing.__init__ param."""
    cls = np.asarray(cls_num_list, dtype=np.float64)
    n_1 = cls.max()
    n_K = cls.min()
    if shape == 'concave':
        smooth = smooth_tail + (smooth_head - smooth_tail) * np.sin(
            (cls - n_K) * np.pi / (2 * (n_1 - n_K)))
    elif shape == 'linear':
        smooth = smooth_tail + (smooth_head - smooth_tail) * (cls - n_K) / (n_1 - n_K)
    elif shape == 'convex':
        smooth = smooth_head + (smooth_head - smooth_tail) * np.sin(
            1.5 * np.pi + (cls - n_K) * np.pi / (2 * (n_1 - n_K)))
    elif shape == 'exp' and power is not None:
        smooth = smooth_tail + (smooth_head - smooth_tail) * np.power(
            (cls - n_K) / (n_1 - n_K), power)
    else:
        raise ValueError("bad shape")
    return jnp.asarray(smooth.astype(np.float32))


def _reference(x, target, smooth):
    """Pure-JAX reference mirroring the PyTorch forward."""
    smoothing = smooth[target]
    confidence = 1.0 - smoothing
    logprobs = jax.nn.log_softmax(x.astype(jnp.float32), axis=-1)
    nll = -jnp.take_along_axis(logprobs, target[:, None], axis=-1)[:, 0]
    smooth_loss = -jnp.mean(logprobs, axis=-1)
    return jnp.mean(confidence * nll + smoothing * smooth_loss)


if __name__ == "__main__":
    B, C = 16, 128   # small demo: batch tiles of 8 rows, 128 classes (1 lane-width)

    # Deterministic long-tailed per-class sample counts, head -> tail.
    cls_num_list = np.round(1000.0 * np.power(0.96, np.arange(C))).astype(np.int64)
    smooth = make_smooth(cls_num_list, smooth_head=0.3, smooth_tail=0.0,
                         shape='concave')

    key = jax.random.PRNGKey(0)
    kx, kt = jax.random.split(key)
    x = jax.random.normal(kx, (B, C), dtype=jnp.float32)
    target = jax.random.randint(kt, (B,), 0, C, dtype=jnp.int32)

    loss = jax.block_until_ready(label_aware_smoothing_loss(x, target, smooth))
    ref = _reference(x, target, smooth)
    assert jnp.allclose(loss, ref, atol=1e-5, rtol=1e-5), (loss, ref)

    # Also exercise the non-divisible-batch (padding) path.
    B2 = 13
    x2 = jax.random.normal(jax.random.PRNGKey(1), (B2, C), dtype=jnp.float32)
    t2 = jax.random.randint(jax.random.PRNGKey(2), (B2,), 0, C, dtype=jnp.int32)
    loss2 = jax.block_until_ready(label_aware_smoothing_loss(x2, t2, smooth))
    ref2 = _reference(x2, t2, smooth)
    assert jnp.allclose(loss2, ref2, atol=1e-5, rtol=1e-5), (loss2, ref2)

    print("KERNEL_OK")
</pallas_src>

<mosaic_0001>
module attributes {stable_mosaic.version = 11 : i64} {
  func.func @_las_kernel(%arg0: i32, %arg1: memref<8x128xf32, #tpu.memory_space<vmem>>, %arg2: memref<8x3xf32, #tpu.memory_space<vmem>>, %arg3: memref<1x1x128xf32, #tpu.memory_space<vmem>>) attributes {dimension_semantics = [#tpu.dimension_semantics<parallel>], iteration_bounds = array<i64: 2>, scalar_prefetch = 0 : i64, scratch_operands = 0 : i64, tpu.core_type = #tpu.core_type<tc>, window_params = [{transform_indices = @transform_0, window_bounds = array<i64: 8, 128>}, {transform_indices = @transform_1, window_bounds = array<i64: 8, 3>}, {transform_indices = @transform_2, window_bounds = array<i64: 1, 1, 128>}]} {
    %c0 = arith.constant 0 : index
    %c0_0 = arith.constant 0 : index
    %0 = vector.load %arg1[%c0, %c0_0] : memref<8x128xf32, #tpu.memory_space<vmem>>, vector<8x128xf32>
    %c0_1 = arith.constant 0 : index
    %c0_2 = arith.constant 0 : index
    %1 = vector.load %arg2[%c0_1, %c0_2] : memref<8x3xf32, #tpu.memory_space<vmem>>, vector<8x3xf32>
    %2 = vector.extract_strided_slice %1 {offsets = [0, 0], sizes = [8, 1], strides = [1, 1]} : vector<8x3xf32> to vector<8x1xf32>
    %3 = arith.fptosi %2 : vector<8x1xf32> to vector<8x1xi32>
    %4 = vector.extract_strided_slice %1 {offsets = [0, 1], sizes = [8, 1], strides = [1, 1]} : vector<8x3xf32> to vector<8x1xf32>
    %5 = vector.extract_strided_slice %1 {offsets = [0, 2], sizes = [8, 1], strides = [1, 1]} : vector<8x3xf32> to vector<8x1xf32>
    %cst = arith.constant dense<0xFF800000> : vector<8xf32>
    %6 = vector.multi_reduction <maximumf>, %0, %cst [1] : vector<8x128xf32> to vector<8xf32>
    %7 = vector.shape_cast %6 : vector<8xf32> to vector<8x1xf32>
    %8 = vector.broadcast %7 : vector<8x1xf32> to vector<8x128xf32>
    %9 = arith.subf %0, %8 : vector<8x128xf32>
    %10 = math.exp %9 : vector<8x128xf32>
    %cst_3 = arith.constant 1.000000e+00 : f32
    %11 = vector.broadcast %cst_3 : f32 to vector<128x128xf32>
    %cst_4 = arith.constant dense<0.000000e+00> : vector<8x128xf32>
    %12 = tpu.matmul %10, %11, %cst_4 {dimension_numbers = #tpu.dot_dimension_numbers<[1], [0], [0], [1], [0, 0, 1, 1], [], []>} : vector<8x128xf32>, vector<128x128xf32>, vector<8x128xf32> -> vector<8x128xf32>
    %13 = vector.extract_strided_slice %12 {offsets = [0, 0], sizes = [8, 1], strides = [1, 1]} : vector<8x128xf32> to vector<8x1xf32>
    %cst_5 = arith.constant dense<0.000000e+00> : vector<8x128xf32>
    %14 = tpu.matmul %0, %11, %cst_5 {dimension_numbers = #tpu.dot_dimension_numbers<[1], [0], [0], [1], [0, 0, 1, 1], [], []>} : vector<8x128xf32>, vector<128x128xf32>, vector<8x128xf32> -> vector<8x128xf32>
    %15 = vector.extract_strided_slice %14 {offsets = [0, 0], sizes = [8, 1], strides = [1, 1]} : vector<8x128xf32> to vector<8x1xf32>
    %16 = math.log %13 : vector<8x1xf32>
    %17 = arith.addf %16, %7 : vector<8x1xf32>
    %cst_6 = arith.constant 7.812500e-03 : f32
    %18 = vector.broadcast %cst_6 : f32 to vector<8x1xf32>
    %19 = arith.mulf %15, %18 : vector<8x1xf32>
    %20 = tpu.iota {dimensions = array<i32: 1>} : vector<8x128xi32>
    %21 = vector.broadcast %3 : vector<8x1xi32> to vector<8x128xi32>
    %22 = arith.cmpi eq, %20, %21 : vector<8x128xi32>
    %cst_7 = arith.constant 0.000000e+00 : f32
    %23 = vector.broadcast %cst_7 : f32 to vector<8x128xf32>
    %24 = arith.select %22, %0, %23 : vector<8x128xi1>, vector<8x128xf32>
    %cst_8 = arith.constant dense<0.000000e+00> : vector<8xf32>
    %25 = vector.multi_reduction <add>, %24, %cst_8 [1] : vector<8x128xf32> to vector<8xf32>
    %26 = vector.shape_cast %25 : vector<8xf32> to vector<8x1xf32>
    %27 = arith.subf %17, %26 : vector<8x1xf32>
    %28 = arith.mulf %4, %27 : vector<8x1xf32>
    %29 = arith.subf %17, %19 : vector<8x1xf32>
    %30 = arith.mulf %5, %29 : vector<8x1xf32>
    %31 = arith.addf %28, %30 : vector<8x1xf32>
    %32 = vector.shape_cast %31 : vector<8x1xf32> to vector<1x8x1xf32>
    %cst_9 = arith.constant dense<0.000000e+00> : vector<1xf32>
    %33 = vector.multi_reduction <add>, %32, %cst_9 [1, 2] : vector<1x8x1xf32> to vector<1xf32>
    %34 = vector.shape_cast %33 : vector<1xf32> to vector<1x1x1xf32>
    %35 = vector.extract %34[0, 0, 0] : f32 from vector<1x1x1xf32>
    %36 = vector.broadcast %35 : f32 to vector<1x1x128xf32>
    %c0_10 = arith.constant 0 : index
    %c0_11 = arith.constant 0 : index
    %c0_12 = arith.constant 0 : index
    %37 = vector.load %arg3[%c0_10, %c0_11, %c0_12] : memref<1x1x128xf32, #tpu.memory_space<vmem>>, vector<1x1x128xf32>
    tpu.vector_store %arg3[%c0_10, %c0_11, %c0_12], %36 {strides = array<i32>} : memref<1x1x128xf32, #tpu.memory_space<vmem>>, vector<1x1x128xf32>,
    return
  }
  func.func @transform_0(%arg0: i32) -> (i32, i32) {
    %c0_i32 = arith.constant 0 : i32
    %c0_i32_0 = arith.constant 0 : i32
    return %arg0, %c0_i32 : i32, i32
  }
  func.func @transform_1(%arg0: i32) -> (i32, i32) {
    %c0_i32 = arith.constant 0 : i32
    %c0_i32_0 = arith.constant 0 : i32
    return %arg0, %c0_i32 : i32, i32
  }
  func.func @transform_2(%arg0: i32) -> (i32, i32, i32) {
    %c0_i32 = arith.constant 0 : i32
    %c0_i32_0 = arith.constant 0 : i32
    %c0_i32_1 = arith.constant 0 : i32
    return %arg0, %c0_i32, %c0_i32_0 : i32, i32, i32
  }
}

</mosaic_0001>

<bundles_post_ra>
// kernel: tpu_custom_call.1
= control target key start
LH: loop header
LB: loop body
LE: loop exit
PB: predicated region body
PF: predicated region fallthrough
CT: control target
= control target key end

     0   :  { %7 = vsyncpa [#allocation3], 0  ;;  %s822_s0 = inlined_call_operand.vmem [shape: f32[16,128], index: 0, kind: input, shape index: {}]   ;;  %s823_s1 = inlined_call_operand.vmem [shape: f32[16,3], index: 1, kind: input, shape index: {}]   ;;  %s824_s2 = inlined_call_operand.hbm [shape: f32[2,1,128], index: 2, kind: output, shape index: {}]  }
   0x1   :  { %9 = vsyncpa [#allocation3 + $0x1], 0  ;;  %s719_s9 = smov 0   ;;  %s721_s10 = smov 0  }
   0x2   :  { %s723_s11 = smov 0   ;;  %s725_s12 = smov 0  }
   0x3 LB: > { %s740_s13 = sadd.s32 4294967295, %s693_s12   ;;  %s430_s14 = sadd.s32 4294967294, %s693_s12   ;;  %s693_s12 = sphi %s725_s12, %s830_s12   ;;  %s689_s11 = sphi %s723_s11, %s829_s11   ;;  %s685_s10 = sphi %s721_s10, %s828_s10   ;;  %s681_s9 = sphi %s719_s9, %s827_s9  }
   0x4   : > { %s744_s15 = sadd.s32 1, %s693_s12   ;;  %s74_s16 = sadd.s32 1, %s689_s11 }
   0x5   : > { %s71_s17 = ssub.s32 %s693_s12, %s744_s15  ;;  %p84_p0 = scmp.ne.s32.totalorder %s689_s11, %s685_s10 }
   0x6   : > { %p72_p1 = scmp.eq.s32.totalorder %s71_s17, 0  ;;  %p85_p2 = scmp.eq.s32.totalorder %s740_s13, 1 }
   0x7   : > { %p90_p3 = scmp.ne.s32.totalorder %s685_s10, %s681_s9  ;;  %p91_p4 = scmp.eq.s32.totalorder %s430_s14, 1 }
   0x8   : > { %s755_s18 = scalar_select %p72_p1, %s689_s11, %s74_s16  }
   0x9   : > { %p757_p5 = por %p85_p2, %p84_p0  ;;  %p761_p6 = por %p91_p4, %p90_p3 }
   0xa   : > { %p433_p7 = scmp.ge.s32.totalorder %s693_s12, 1  ;;  %p123_p8 = scmp.lt.s32.totalorder %s693_s12, 3 }
   0xc   : > { %p124_p9 = pnand %p433_p7, %p123_p8 }
   0xd   : > { %p147_p10 = scmp.lt.s32.totalorder (!%p124_p9), %s740_s13, 1  ;;  %v695_v0 = vmov (!%p124_p9), 0   ;;  %v696_v1 = vmov (!%p124_p9), 0.0|0.0   ;;  %v697_v2 = vmov (!%p124_p9), 1.0|1.0   ;;  %vm698_vm0 = vmmov (!%p124_p9), 0  }
   0xe   : > { %127 = sbr.rel (%p124_p9) target bundleno = 981 (0x3d5), region = 28  ;;  %626 = vset.pattern.permute.xlu0 (!%p124_p9), %v695_v0  ;;  %543 = vmatprep.subr.bf16.mxu0 (!%p124_p9), %v696_v1  ;;  %v699_v7 = vmov (!%p124_p9), 0.0   ;;  %v307_v10 = vlaneseq (!%p124_p9)  ;;  %s700_s29 = smov (!%p124_p9), 2   ;;  %vm337_vm2 = vcmask (!%p124_p9), 7168  }
   0xf   : > { %544 = vmatpush3.bf16.msra.mxu0 (!%p124_p9), %v697_v2  ;;  %559 = vmatprep.subr.bf16.mxu1 (!%p124_p9), %v696_v1  ;;  %s701_s30 = smov (!%p124_p9), 1   ;;  %s702_s3 = smov (!%p124_p9), 127  }
  0x10   : > { %545 = vmatprep.subr.bf16.mxu0 (!%p124_p9), %v696_v1  ;;  %560 = vmatpush3.bf16.msra.mxu1 (!%p124_p9), %v697_v2  ;;  %v308_v12 = vand.u32 (!%p124_p9), 127, %v307_v10  ;;  %s145_s4 = sand.u32 (!%p124_p9), 1, %s685_s10   ;;  %s436_s7 = sshll.u32 (!%p124_p9), %s740_s13, 4 }
  0x11   : > { %561 = vmatprep.subr.bf16.mxu1 (!%p124_p9), %v696_v1  ;;  %505 = vmatprep.mubr.msk.f32.mxu0 (!%p124_p9), %vm698_vm0, %v699_v7  ;;  %s146_s5 = scalar_lea.vmem (!%p124_p9), [#allocation2], %s145_s4  ;;  %s782_s17 = scalar_lea.hbm (!%p124_p9), %s824_s2, %s436_s7 }
  0x12   : > { %540 = vmatprep.mubr.msk.f32.mxu1 (!%p124_p9), %vm698_vm0, %v699_v7  ;;  %s363_s6 = sshll.u32 (!%p124_p9), %s146_s5, 4  ;;  %s777_s6 = int_to_ptr.vmem [resolvable:$true] %s363_s6 }
  0x13   : > { %546 = vmatpush3.bf16.msra.mxu0 (!%p124_p9), %v697_v2 }
  0x14   : > { %547 = vmatprep.subr.bf16.mxu0 (!%p124_p9), %v696_v1  ;;  %562 = vmatpush3.bf16.msra.mxu1 (!%p124_p9), %v697_v2 }
  0x15   : > { %s148_s21 = scalar_select %p147_p10, %s740_s13, 1  ;;  %563 = vmatprep.subr.bf16.mxu1 %v696_v1 }
  0x16   : > { %s703_s13 = smov [#allocation2]  }
  0x17   : > { %s434_s22 = sshll.u32 %s148_s21, 3  ;;  %548 = vmatpush3.bf16.msra.mxu0 %v697_v2  ;;  %s351_s21 = scalar_lea.sflag [#allocation3], %s145_s4 }
  0x18   : > { %s150_s25 = scalar_lea.vmem %s822_s0, %s434_s22  ;;  %549 = vmatprep.subr.bf16.mxu0 %v696_v1  ;;  %564 = vmatpush3.bf16.msra.mxu1 %v697_v2  ;;  %s154_s28 = scalar_lea.vmem %s823_s1, %s434_s22 }
  0x19   : > { %v155_v3 = vld [vmem:[%s150_s25] sm:$0xff]  ;;  %565 = vmatprep.subr.bf16.mxu1 %v696_v1  ;;  %s631_s22 = scalar_lea.vmem %s777_s6, 16  ;;  %s635_s23 = sshll.u32 %s703_s13, 4  ;;  %s636_s23 = int_to_ptr.vmem [resolvable:$false] %s635_s23 }
  0x1a   : > { %158 = vmax.xlane.f32.xlu0 %v155_v3  ;;  %v156_v4 = vld [vmem:[%s154_s28] sm:$0xff]  ;;  %p632_p11 = scmp.ne.s32.totalorder %s777_s6, %s631_s22  ;;  %s637_s24 = scalar_lea.vmem %s636_s23, 32 }
  0x1b   : > { %550 = vmatpush3.bf16.msra.mxu0 %v697_v2  ;;  %v575_v5 = vtrunc.f32 %v156_v4  ;;  %p638_p0 = scmp.lt.s32.totalorder %s777_s6, %s636_s23  ;;  %p639_p1 = scmp.lt.s32.totalorder %s637_s24, %s631_s22 }
  0x1c   : > { %551 = vmatprep.subr.bf16.mxu0 %v696_v1  ;;  %566 = vmatpush3.bf16.msra.mxu1 %v697_v2  ;;  %p633_p12 = pnand %p632_p11, %p757_p5 }
  0x1d   : > { %567 = vmatprep.subr.bf16.mxu1 %v696_v1  ;;  %v576_v6 = vcvt.f32.s32 %v575_v5  ;;  %p640_p2 = por %p639_p1, %p638_p0 }
  0x1e   : > { %p634_p13 = pneg %p633_p12 }
  0x1f   : > { %552 = vmatpush3.bf16.msra.mxu0 %v697_v2 }
  0x20   : > { %553 = vmatprep.subr.bf16.mxu0 %v696_v1  ;;  %568 = vmatpush3.bf16.msra.mxu1 %v697_v2  ;;  %p641_p3 = pnand %p640_p2, %p634_p13 }
  0x21   : > { %569 = vmatprep.subr.bf16.mxu1 %v696_v1 }
  0x23   : > { %554 = vmatpush3.bf16.msra.mxu0 %v697_v2 }
  0x24   : > { %555 = vmatprep.subr.bf16.mxu0 %v696_v1  ;;  %570 = vmatpush3.bf16.msra.mxu1 %v697_v2 }
  0x25   : > { %571 = vmatprep.subr.bf16.mxu1 %v696_v1 }
  0x27   : > { %556 = vmatpush3.bf16.msra.mxu0 %v697_v2 }
  0x28   : > { %557 = vmatprep.subr.bf16.mxu0 %v696_v1  ;;  %572 = vmatpush3.bf16.msra.mxu1 %v697_v2 }
  0x29   : > { %573 = vmatprep.subr.bf16.mxu1 %v696_v1 }
  0x2b   : > { %558 = vmatpush3.bf16.msra.mxu0 %v697_v2 }
  0x2c   : > { %574 = vmatpush3.bf16.msra.mxu1 %v697_v2 }
  0x2f   : > { %541 = vmatmul.mubr.f32.vlgmr.msra.gmra.mrb[0].mxu1 %v155_v3 }
  0x30   : > { %310 = vperm.xlu0 %626, %v576_v6  }
  0xa7   : > { %v159_v8 = vpop.xlane.xlu0 %158 }
  0xa8   : > { %v160_v9 = vsub.f32 %v155_v3, %v159_v8 }
  0xaa   : > { %v161_v11 = vmul.f32 1.442695, %v160_v9 }
  0xac   : > { %627 = vpow2.f32 %v161_v11 }
  0xaf   : > { %v311_v13 = vpop.permute.xlu0 %310 }
  0xb0   : > { %vm312_vm1 = vcmp.eq.s32.totalorder %v308_v12, %v311_v13 }
  0xb1   : > { %v313_v14 = vsel %vm312_vm1, %v155_v3, 0.0 }
  0xb2   : > { %314 = vadd.xlane.f32.xlu1 %v313_v14 }
  0xb6   : > { %v628_v15 = vpop.eup %627 }
  0xb7   : > { %506 = vmatmul.mubr.f32.vlgmr.msra.gmra.mrb[0].mxu0 %v628_v15 }
 0x102   : > { %v299_v16 = vpop.f32.mrb[0].mxu1 }
 0x103   : > { %v542_v17 = vpop.f32.mrb[1].mxu1  ;;  %v306_v22 = vmul.f32 0.0078125, %v299_v16 }
 0x13f   : > { %v315_v25 = vpop.xlane.xlu1 %314 }
 0x18a   : > { %v229_v18 = vpop.f32.mrb[0].mxu0 }
 0x18b   : > { %629 = vlog2.f32 %v229_v18  ;;  %v507_v19 = vpop.f32.mrb[1].mxu0 }
 0x195   : > { %v630_v20 = vpop.eup %629 }
 0x196   : > { %v304_v21 = vmul.f32 0.6931472, %v630_v20 }
 0x198   : > { %v305_v23 = vadd.f32 %v304_v21, %v159_v8 }
 0x19a   : > { %v322_v24 = vsub.f32 %v305_v23, %v306_v22  ;;  %v316_v26 = vsub.f32 %v305_v23, %v315_v25 }
 0x19c   : > { %324 = vrot.lane.b32.xlu1 %v322_v24, %s700_s29 }
 0x1a0   : > { %318 = vrot.lane.b32.xlu1 %v316_v26, %s701_s30 }
 0x20e   : > { %v325_v27 = vpop.permute.xlu1 %324 }
 0x20f   : > { %v327_v28 = vmul.f32 %v325_v27, %v156_v4 }
 0x211   : > { %329 = vrot.lane.b32.xlu1 %v327_v28, %s702_s3 }
 0x212   : > { %v319_v29 = vpop.permute.xlu1 %318 }
 0x213   : > { %v321_v30 = vmul.f32 %v319_v29, %v156_v4 }
 0x283   : > { %v330_v31 = vpop.permute.xlu1 %329 }
 0x284   : > { %v332_v32 = vadd.f32 %v330_v31, %v321_v30 }
 0x286   : > { %334 = vrot.lane.b32.xlu1 %v332_v32, %s702_s3 }
 0x2f8   : > { %v335_v33 = vpop.permute.xlu1 %334 }
 0x2f9   : > { %v338_v34 = vsel %vm337_vm2, %v335_v33, 0.0 }
 0x2fa   : > { %339 = vadd.xlane.f32.xlu1 %v338_v34 }
 0x387   : > { %v340_v35 = vpop.xlane.xlu1 %339 }
 0x388   : > { %v341_v36 = vrot.slane %v340_v35, 4 }
 0x38a   : > { %v342_v37 = vadd.f32 %v341_v36, %v340_v35 }
 0x38c   : > { %v343_v38 = vrot.slane %v342_v37, 2 }
 0x38e   : > { %v344_v39 = vadd.f32 %v343_v38, %v342_v37 }
 0x390   : > { %v345_v40 = vrot.slane %v344_v39, 1 }
 0x392   : > { %v346_v41 = vadd.f32 %v345_v40, %v344_v39 }
 0x394   : > { %577 = vpush %v346_v41 }
 0x3c5   : > { %s578_s8 = spop %577 }
 0x3c6   : > { %v348_v42 = vstv %s578_s8 }
 0x3c7   : > { %349 = vst [vmem:[%s146_s5] sm:$0x1] %v348_v42 }
 0x3c8   : > { %644 = shalt.err (!%p641_p3)
}
 0x3c9   : > { %s645_s25 = scalar_lea.hbm %s782_s17, 16  ;;  %s649_s28 = scalar_lea.hbm %s824_s2, 32 }
 0x3ca   : > { %p646_p4 = scmp.ne.s32.totalorder %s782_s17, %s645_s25  ;;  %p650_p9 = scmp.lt.u32.totalorder %s782_s17, %s824_s2 }
 0x3cb   : > { %p651_p10 = scmp.lt.u32.totalorder %s649_s28, %s645_s25  ;;  %p653_p12 = scmp.lt.u32.totalorder %s645_s25, %s782_s17 }
 0x3cc   : > { %p647_p7 = pnand %p646_p4, %p757_p5 }
 0x3cd   : > { %p652_p11 = por %p651_p10, %p650_p9 }
 0x3ce   : > { %p648_p8 = pneg %p647_p7 }
 0x3cf   : > { %p654_p13 = por %p653_p12, %p652_p11 }
 0x3d1   : > { %p655_p0 = pnand %p654_p13, %p648_p8 }
 0x3d3   : > { %658 = shalt.err (!%p655_p0)
}
 0x3d4   : > { %579 = dma.vmem_to_hbm [thread:$0]  (%p757_p5), %s777_s6, 16, %s782_s17, %s351_s21  }
 0x3d5 PF: > { %p585_p1 = scmp.ge.s32.totalorder %s693_s12, 2  ;;  %s375_s3 = sand.u32 1, %s681_s9  }
 0x3d6   : > { %s376_s4 = scalar_lea.sflag [#allocation3], %s375_s3 }
 0x3d7   : > { %p582_p2 = pnand %p585_p1, %p761_p6 }
 0x3d9   : > { %676 = dma.done.wait (!%p582_p2), %s376_s4, 16  }
 0x3da   : > { %678 = vsyncadd (!%p582_p2), %s376_s4, 4294967280  ;;  %p12_p3 = scmp.ge.s32.totalorder %s744_s15, 4   ;;  %s827_s9 = smov %s685_s10 }
 0x3db   : > { %s828_s10 = smov %s689_s11  ;;  %s829_s11 = smov %s755_s18 }
 0x3dc   : > { %s830_s12 = smov %s744_s15  ;;  %14 = sbr.rel (!%p12_p3) target bundleno = 3 (0x3), region = 66 }
 0x3e3   :  { %380 = vsyncpa [#allocation3], 1 }
 0x3e4   :  { %382 = vsyncpa [#allocation3 + $0x1], 1 }

</bundles_post_ra>
